<compile_context>
chip_gen: v7x
topology: tpu7x:2x2x1
jax: 0.10.0
libtpu: 0.0.40
codegen_flags: <defaults>
</compile_context>

<pallas_src>
from collections import Counter

import numpy as np
import jax
import jax.numpy as jnp
from jax.experimental import pallas as pl
from jax.experimental.pallas import tpu as pltpu


# ----------------------------------------------------------------------------
# Pallas kernel 1: pairwise Euclidean distances (masked points only)
# ----------------------------------------------------------------------------

def _pdist_kernel(a_ref, b_ref, o_ref):
    """One (tile_i, tile_j) tile of the pairwise distance matrix.

    Inputs are norm-augmented point matrices:
        A = [p, |p|^2, 1],  B = [-2 q, 1, |q|^2]
    so that  A @ B.T = |p|^2 - 2 p.q + |q|^2 = |p - q|^2  is one MXU matmul.
    The sqrt is fused here (EUP) instead of an O(n^2) host-side numpy pass.
    """
    d = jax.lax.dot_general(a_ref[...], b_ref[...], (((1,), (1,)), ((), ())),
                            preferred_element_type=jnp.float32)
    # TODO(synk): the |p|^2+|q|^2-2p.q formulation can cancel catastrophically
    # for near-identical points; clamping keeps it >=0 but tiny distances lose
    # relative precision vs an explicit (p-q)^2 evaluation.
    o_ref[...] = jnp.sqrt(jnp.maximum(d, 0.0))


def _pick_tile(n_pad, prefer_multi=False):
    """Largest tile in {512, 256, 128} dividing n_pad.  With prefer_multi, also
    require >=2 blocks along the axis so Mosaic can shard the leading parallel
    grid dim across v7x's two TensorCores (neutral on v5e/v6e)."""
    for t in (512, 256, 128):
        if n_pad % t == 0 and (not prefer_multi or n_pad // t >= 2):
            return t
    return 128


def pairwise_dist(a_aug, b_aug):
    n_pad, da = a_aug.shape
    tile_i = _pick_tile(n_pad, prefer_multi=True)
    tile_j = _pick_tile(n_pad, prefer_multi=False)
    grid = (n_pad // tile_i, n_pad // tile_j)
    # K ~= 9, so the kernel is store/DMA-bound, not MXU-bound: big output tiles
    # and few grid steps are what matter.  Max pipelined VMEM here is
    # 2*(512*512*4) + inputs ~ 3 MiB, well under the default scoped limit on
    # all generations (incl. v7x's 64 MiB physical), so no vmem_limit override.
    # TODO(synk): symmetry (only j >= i tiles) would halve MXU + writeback but
    # needs a packed-triangle D2H path to also halve transfer bytes; skipped.
    return pl.pallas_call(
        _pdist_kernel,
        out_shape=jax.ShapeDtypeStruct((n_pad, n_pad), jnp.float32),
        grid=grid,
        in_specs=[pl.BlockSpec((tile_i, da), lambda i, j: (i, 0)),
                  pl.BlockSpec((tile_j, da), lambda i, j: (j, 0))],
        out_specs=pl.BlockSpec((tile_i, tile_j), lambda i, j: (i, j)),
        compiler_params=pltpu.CompilerParams(
            dimension_semantics=("parallel", "parallel")),
    )(a_aug, b_aug)


# ----------------------------------------------------------------------------
# Pallas kernel 2: aux-task masked MSE (tiled streaming reduction)
# ----------------------------------------------------------------------------

def _mse_sum_kernel(pred_ref, mask_ref, tgt_ref, o_ref, acc_ref):
    step = pl.program_id(0)

    @pl.when(step == 0)
    def _():
        acc_ref[...] = jnp.zeros_like(acc_ref)

    diff = pred_ref[...] * mask_ref[...] - tgt_ref[...]
    acc_ref[...] += jnp.sum(diff * diff, axis=0, keepdims=True)   # (1, 128)

    @pl.when(step == pl.num_programs(0) - 1)
    def _():
        o_ref[0] = jnp.sum(acc_ref[...])


def masked_mse(pred, msk, tgt, tile_rows=2048):
    """torch.nn.MSELoss()(pred * msk, tgt)  (mean reduction)."""
    count = int(np.prod(pred.shape))
    lanes = 128
    rows = -(-count // lanes)
    tile_rows = min(tile_rows, max(rows, 1))
    rows_pad = -(-rows // tile_rows) * tile_rows
    padded = rows_pad * lanes
    grid = (rows_pad // tile_rows,)

    def prep(x):
        flat = jnp.asarray(x, jnp.float32).reshape(-1)
        flat = jnp.pad(flat, (0, padded - count))     # zero padding adds 0 to sum
        return flat.reshape(rows_pad, lanes)

    s = pl.pallas_call(
        _mse_sum_kernel,
        out_shape=jax.ShapeDtypeStruct((1,), jnp.float32),
        grid=grid,
        in_specs=[pl.BlockSpec((tile_rows, lanes), lambda i: (i, 0))] * 3,
        out_specs=pl.BlockSpec((1,), lambda i: (0,),
                               memory_space=pltpu.MemorySpace.SMEM),
        scratch_shapes=[pltpu.VMEM((1, lanes), jnp.float32)],
        compiler_params=pltpu.CompilerParams(
            dimension_semantics=("arbitrary",)),
    )(prep(pred), prep(msk), prep(tgt))
    return s[0] / jnp.float32(count)


# ----------------------------------------------------------------------------
# Host-side graph algorithms (sequential — same role as the CPU C extensions
# used by the original torch module).
# ----------------------------------------------------------------------------

def _prim_emst(dist):
    """Euclidean minimum spanning tree over a dense distance matrix."""
    n = dist.shape[0]
    in_tree = np.zeros(n, dtype=bool)
    in_tree[0] = True
    best = dist[0].copy()
    best_src = np.zeros(n, dtype=np.int64)
    edges = []
    for _ in range(n - 1):
        cand = np.where(in_tree, np.inf, best)
        v = int(np.argmin(cand))
        edges.append((int(best_src[v]), v, float(cand[v])))
        in_tree[v] = True
        upd = dist[v] < best
        best = np.where(upd, dist[v], best)
        best_src = np.where(upd, v, best_src)
    return edges


def _um_pair_counts(edges, labels):
    """For MST edges processed in increasing distance (Kruskal) order, count
    positive (same gt label) and negative pairs whose ultrametric distance is
    set by that edge.  Union-find with per-cluster label histograms."""
    n = labels.shape[0]
    parent = list(range(n))

    def find(x):
        while parent[x] != x:
            parent[x] = parent[parent[x]]
            x = parent[x]
        return x

    counts = [Counter({int(labels[i]): 1}) for i in range(n)]
    sizes = [1] * n
    num_pos = np.zeros(len(edges), np.float32)
    num_neg = np.zeros(len(edges), np.float32)
    for k, (u, v, _) in enumerate(edges):
        ru, rv = find(u), find(v)
        cu, cv = counts[ru], counts[rv]
        small, big = (cu, cv) if len(cu) <= len(cv) else (cv, cu)
        pos = float(sum(cnt * big.get(l, 0) for l, cnt in small.items()))
        tot = float(sizes[ru] * sizes[rv])
        num_pos[k] = pos
        num_neg[k] = tot - pos
        if sizes[ru] < sizes[rv]:
            ru, rv = rv, ru
        parent[rv] = ru
        sizes[ru] += sizes[rv]
        counts[ru].update(counts[rv])
    return num_pos, num_neg


# ----------------------------------------------------------------------------
# ultrametric_loss (forward only)
# ----------------------------------------------------------------------------

def ultrametric_loss(embedding, gt_seg, mask, alpha, add_coordinates,
                     coordinate_scale, balance, quadrupel_loss,
                     constrained_emst):
    # TODO(synk): quadrupel_loss and constrained_emst variants not implemented.
    del quadrupel_loss, constrained_emst
    emb = jnp.asarray(embedding, jnp.float32)
    b, c = emb.shape[0], emb.shape[1]
    spatial = emb.shape[2:]
    assert b == 1, "single-sample loss, like the original module"
    n = int(np.prod(spatial))

    pts = emb[0].reshape(c, n).T                                     # (N, C)
    if add_coordinates:
        grids = jnp.meshgrid(
            *[jnp.arange(s, dtype=jnp.float32) for s in spatial], indexing="ij")
        coords = jnp.stack(
            [g * jnp.float32(s) for g, s in zip(grids, coordinate_scale)],
            axis=0).reshape(len(spatial), n).T                       # (N, S)
        pts = jnp.concatenate([pts, coords], axis=1)                 # (N, D)

    # --- host mask -> selected indices (n scalars; cheap transfer) ---
    mask_np = np.asarray(mask).reshape(-1) > 0.5
    labels_np = np.asarray(gt_seg).reshape(-1)
    sel = np.nonzero(mask_np)[0]
    n_sel = int(sel.size)
    if n_sel < 2:
        zero = jnp.zeros((), jnp.float32)
        empty = np.zeros((0, 3), np.float32)
        return zero, empty, empty, empty, zero, zero, zero

    # --- device: gather masked points only, then pairwise distances on MXU ---
    # Computing only the (n_sel_pad)^2 submatrix shrinks MXU work, HBM
    # writeback and the device->host copy by (n_sel/n)^2 vs the full volume.
    pts_sel = jnp.take(pts, jnp.asarray(sel, dtype=jnp.int32), axis=0)  # (n_sel, D)
    n_pad = -(-n_sel // 128) * 128
    pts_p = jnp.pad(pts_sel, ((0, n_pad - n_sel), (0, 0)))
    nrm = jnp.sum(pts_p * pts_p, axis=1, keepdims=True)
    ones = jnp.ones_like(nrm)
    a_aug = jnp.concatenate([pts_p, nrm, ones], axis=1)
    b_aug = jnp.concatenate([-2.0 * pts_p, ones, nrm], axis=1)
    dist_mat = pairwise_dist(a_aug, b_aug)                           # (n_pad, n_pad)

    # Only the (n_sel, n_sel) submatrix (sliced on device) and the selected
    # points go to the host.
    dsel, pts_sel_np = jax.device_get((dist_mat[:n_sel, :n_sel], pts_sel))

    # --- host-side: EMST + ultrametric pair counting ---
    # TODO(synk): mlpack EMST / um_loss C extensions are sequential graph code
    # with no clean Pallas equivalent; run them host-side (as the original
    # module runs them on CPU).
    edges = _prim_emst(np.asarray(dsel))
    edges.sort(key=lambda e: e[2])
    num_pos, num_neg = _um_pair_counts(edges, labels_np[sel])
    d_arr = np.array([e[2] for e in edges], np.float32)

    # --- per-edge ultrametric loss reduction: numpy dots on host-resident data
    # (cheaper than a kernel launch + three H2D copies + one D2H copy) ---
    hinge = np.maximum(np.float32(alpha) - d_arr, 0.0)
    sum_pos = float(np.dot(num_pos, d_arr * d_arr))
    sum_neg = float(np.dot(num_neg, hinge * hinge))

    n_pos = float(num_pos.sum())
    n_neg = float(num_neg.sum())
    total = max(n_pos + n_neg, 1.0)
    ratio_pos = jnp.float32(n_pos / total)
    ratio_neg = jnp.float32(n_neg / total)
    if balance:
        loss = sum_pos / max(n_pos, 1.0) + sum_neg / max(n_neg, 1.0)
    else:
        loss = (sum_pos + sum_neg) / total
    loss = jnp.float32(loss)

    emst = np.stack([np.array([sel[u] for u, _, _ in edges], np.float32),
                     np.array([sel[v] for _, v, _ in edges], np.float32),
                     d_arr], axis=1)
    edges_u = np.asarray(pts_sel_np)[[u for u, _, _ in edges]]
    edges_v = np.asarray(pts_sel_np)[[v for _, v, _ in edges]]
    return (loss, emst, edges_u, edges_v, jnp.asarray(d_arr),
            ratio_pos, ratio_neg)


# ----------------------------------------------------------------------------
# EmbeddingLoss module (JAX version of the torch module; no learnable params)
# ----------------------------------------------------------------------------

SETUP_CONFIG = {
    "NMS_WINDOW_SIZE": (4, 4, 4),
    "VOXEL_SIZE": (1, 1, 1),
    "NMS_THRESHOLD": 0.5,
    "ADD_COORDS": True,
    "COORDINATE_SCALE": 0.1,
    "BALANCE_UM_LOSS": True,
    "QUADRUPLE_LOSS": False,
    "CONSTRAINED": False,
    "ALPHA": 0.5,
    "AUX_TASK": True,
}


class EmbeddingLoss:
    def __init__(self, setup_config):
        self.nms_window_size = tuple(
            a // b for a, b in zip(setup_config["NMS_WINDOW_SIZE"],
                                   setup_config["VOXEL_SIZE"]))
        self.nms_threshold = setup_config["NMS_THRESHOLD"]
        # TODO(synk): NMS module is constructed in __init__ but never used in
        # forward(); skipped here.
        self.add_coordinates = setup_config["ADD_COORDS"]
        voxel_size = np.array(setup_config["VOXEL_SIZE"], dtype=np.float64)
        micron_scale = voxel_size[0]
        self.coordinate_scale = tuple(
            voxel_size / micron_scale * setup_config["COORDINATE_SCALE"])
        self.balance = setup_config["BALANCE_UM_LOSS"]
        self.quadrupel_loss = setup_config["QUADRUPLE_LOSS"]
        self.constrained_emst = setup_config["CONSTRAINED"]
        self.alpha = setup_config["ALPHA"]
        self.aux_task = setup_config["AUX_TASK"]

    def __call__(self, input, target, mask, neighborhood=None,
                 neighborhood_mask=None, neighborhood_target=None):
        (loss, emst, edges_u, edges_v, dist,
         ratio_pos, ratio_neg) = ultrametric_loss(
            embedding=input, gt_seg=target, mask=mask, alpha=self.alpha,
            add_coordinates=self.add_coordinates,
            coordinate_scale=self.coordinate_scale,
            balance=self.balance, quadrupel_loss=self.quadrupel_loss,
            constrained_emst=self.constrained_emst)
        if self.aux_task:
            neighborhood_loss = masked_mse(neighborhood, neighborhood_mask,
                                           neighborhood_target)
            loss = neighborhood_loss * loss
            return (loss, emst, edges_u, edges_v, dist, ratio_pos, ratio_neg,
                    neighborhood_loss)
        return (loss, emst, edges_u, edges_v, dist, ratio_pos, ratio_neg)


# ----------------------------------------------------------------------------

if __name__ == "__main__":
    key = jax.random.PRNGKey(0)
    kx, kt, km, kn, knm, knt = jax.random.split(key, 6)

    B, C = 1, 4
    Z, Y, X = 4, 8, 8                         # N = 256 points
    emb = jax.random.normal(kx, (B, C, Z, Y, X), jnp.float32) * 0.1
    target = jax.random.randint(kt, (B, 1, Z, Y, X), 1, 4)
    mask = (jax.random.uniform(km, (B, 1, Z, Y, X)) > 0.3).astype(jnp.float32)
    neighborhood = jax.random.normal(kn, (B, 3, Z, Y, X), jnp.float32)
    neighborhood_mask = (jax.random.uniform(knm, (B, 3, Z, Y, X)) > 0.5
                         ).astype(jnp.float32)
    neighborhood_target = jax.random.normal(knt, (B, 3, Z, Y, X), jnp.float32)

    loss_mod = EmbeddingLoss(SETUP_CONFIG)
    out = loss_mod(emb, target, mask, neighborhood, neighborhood_mask,
                   neighborhood_target)

    loss = jax.block_until_ready(out[0])
    nb_loss = jax.block_until_ready(out[-1])
    assert np.isfinite(float(loss)) and np.isfinite(float(nb_loss))
    print("KERNEL_OK")
</pallas_src>

<mosaic_0001>
module attributes {stable_mosaic.version = 11 : i64} {
  func.func @_pdist_kernel(%arg0: i32, %arg1: i32, %arg2: memref<128x9xf32, #tpu.memory_space<vmem>>, %arg3: memref<256x9xf32, #tpu.memory_space<vmem>>, %arg4: memref<128x256xf32, #tpu.memory_space<vmem>>) attributes {dimension_semantics = [#tpu.dimension_semantics<parallel>, #tpu.dimension_semantics<parallel>], iteration_bounds = array<i64: 2, 1>, scalar_prefetch = 0 : i64, scratch_operands = 0 : i64, tpu.core_type = #tpu.core_type<tc>, window_params = [{transform_indices = @transform_0, window_bounds = array<i64: 128, 9>}, {transform_indices = @transform_1, window_bounds = array<i64: 256, 9>}, {transform_indices = @transform_2, window_bounds = array<i64: 128, 256>}]} {
    %c0 = arith.constant 0 : index
    %c0_0 = arith.constant 0 : index
    %0 = vector.load %arg2[%c0, %c0_0] : memref<128x9xf32, #tpu.memory_space<vmem>>, vector<128x9xf32>
    %c0_1 = arith.constant 0 : index
    %c0_2 = arith.constant 0 : index
    %1 = vector.load %arg3[%c0_1, %c0_2] : memref<256x9xf32, #tpu.memory_space<vmem>>, vector<256x9xf32>
    %cst = arith.constant dense<0.000000e+00> : vector<128x256xf32>
    %2 = tpu.matmul %0, %1, %cst {dimension_numbers = #tpu.dot_dimension_numbers<[1], [1], [0], [0], [0, 0, 1, 0], [], []>} : vector<128x9xf32>, vector<256x9xf32>, vector<128x256xf32> -> vector<128x256xf32>
    %cst_3 = arith.constant 0.000000e+00 : f32
    %3 = vector.broadcast %cst_3 : f32 to vector<128x256xf32>
    %4 = arith.maximumf %2, %3 : vector<128x256xf32>
    %5 = math.sqrt %4 : vector<128x256xf32>
    %c0_4 = arith.constant 0 : index
    %c0_5 = arith.constant 0 : index
    %6 = vector.load %arg4[%c0_4, %c0_5] : memref<128x256xf32, #tpu.memory_space<vmem>>, vector<128x256xf32>
    tpu.vector_store %arg4[%c0_4, %c0_5], %5 {strides = array<i32>} : memref<128x256xf32, #tpu.memory_space<vmem>>, vector<128x256xf32>,
    return
  }
  func.func @transform_0(%arg0: i32, %arg1: i32) -> (i32, i32) {
    %c0_i32 = arith.constant 0 : i32
    %c0_i32_0 = arith.constant 0 : i32
    return %arg0, %c0_i32 : i32, i32
  }
  func.func @transform_1(%arg0: i32, %arg1: i32) -> (i32, i32) {
    %c0_i32 = arith.constant 0 : i32
    %c0_i32_0 = arith.constant 0 : i32
    return %arg1, %c0_i32 : i32, i32
  }
  func.func @transform_2(%arg0: i32, %arg1: i32) -> (i32, i32) {
    %c0_i32 = arith.constant 0 : i32
    return %arg0, %arg1 : i32, i32
  }
}

</mosaic_0001>

<bundles_post_ra>
// kernel: tpu_custom_call.1
= control target key start
LH: loop header
LB: loop body
LE: loop exit
PB: predicated region body
PF: predicated region fallthrough
CT: control target
= control target key end

     0   :  { %7 = vsyncpa [#allocation3], 0  ;;  %s2070_s0 = inlined_call_operand.vmem [shape: f32[256,9], index: 0, kind: input, shape index: {}]   ;;  %s2071_s1 = inlined_call_operand.vmem [shape: f32[256,9], index: 1, kind: input, shape index: {}]   ;;  %s2072_s2 = inlined_call_operand.hbm [shape: f32[256,256], index: 2, kind: output, shape index: {}]  }
   0x1   :  { %9 = vsyncpa [#allocation3 + $0x1], 0  ;;  %s1341_s9 = smov 0   ;;  %s1343_s10 = smov 0  }
   0x2   :  { %s1345_s11 = smov 0   ;;  %s1347_s12 = smov 0  }
   0x3   :  { %s1349_s13 = smov 0   ;;  %s1351_s14 = smov 0  }
   0x4 LB: > { %s929_s15 = sadd.s32 4294967295, %s1321_s14   ;;  %s930_s16 = sadd.s32 4294967294, %s1321_s14   ;;  %s1321_s14 = sphi %s1351_s14, %s15_s14   ;;  %s1317_s13 = sphi %s1349_s13, %s2081_s13   ;;  %s1313_s12 = sphi %s1347_s12, %s2080_s12   ;;  %s1309_s11 = sphi %s1345_s11, %s2079_s11   ;;  %s1305_s10 = sphi %s1343_s10, %s2078_s10   ;;  %s1301_s9 = sphi %s1341_s9, %s2077_s9  }
   0x5   : > { %s27_s17 = sadd.s32 1, %s1317_s13  ;;  %s88_s18 = sadd.s32 1, %s1309_s11 }
   0x6   : > { %p29_p0 = scmp.ge.s32.totalorder %s27_s17, 2  ;;  %p98_p1 = scmp.ne.s32.totalorder %s1309_s11, %s1305_s10 }
   0x7   : > { %p99_p2 = scmp.eq.s32.totalorder %s929_s15, 1  ;;  %p104_p3 = scmp.ne.s32.totalorder %s1305_s10, %s1301_s9 }
   0x8   : > { %s2083_s17 = smov (%p29_p0, %s27_s17), 0  ;;  %p105_p5 = scmp.eq.s32.totalorder %s930_s16, 1 }
   0x9   : > { %p1381_p4 = por %p99_p2, %p98_p1  ;;  %s83_s20 = ssub.s32 %s1317_s13, %s2083_s17 }
   0xa   : > { %p934_p6 = scmp.ge.s32.totalorder %s1321_s14, 1  ;;  %p86_p7 = scmp.eq.s32.totalorder %s83_s20, 0 }
   0xb   : > { %p1388_p8 = por %p105_p5, %p104_p3  ;;  %p141_p9 = scmp.lt.s32.totalorder %s1321_s14, 3 }
   0xc   : > { %s1394_s22 = scalar_select %p86_p7, %s1309_s11, %s88_s18  }
   0xd   : > { %p142_p10 = pnand %p934_p6, %p141_p9 }
   0xe   : > { %v214_v0 = vld [vmem:[%s2071_s1 + $0x80] sm:$0xff] (!%p142_p10)  ;;  %v215_v1 = vld [vmem:[%s2071_s1 + $0x88] sm:$0xff] (!%p142_p10)  ;;  %vm230_vm0 = vcmask (!%p142_p10), 72704   ;;  %s936_s29 = sshll.u32 (!%p142_p10), %s1313_s12, 4  ;;  %v216_v6 = vld [vmem:[%s2071_s1 + $0x90] sm:$0xff] (!%p142_p10)  ;;  %s993_s24 = sshll.u32 (!%p142_p10), %s1313_s12, 12 }
   0xf   : > { %145 = sbr.rel (%p142_p10) target bundleno = 379 (0x17b), region = 28  ;;  %v198_v2 = vld [vmem:[%s2071_s1] sm:$0xff] (!%p142_p10)  ;;  %v1058_v3 = vpack.c.bf16 (!%p142_p10), %v215_v1, %v214_v0  ;;  %vm1408_vm1 = vmpackc.low (!%p142_p10), %vm230_vm0, %vm230_vm0  ;;  %v199_v5 = vld [vmem:[%s2071_s1 + $0x8] sm:$0xff] (!%p142_p10)  ;;  %p169_p11 = scmp.lt.s32.totalorder (!%p142_p10), %s936_s29, 31 }
  0x10   : > { %v1061_v7 = vpack.c.bf16 (!%p142_p10), %v199_v5, %v198_v2  ;;  %v217_v8 = vld [vmem:[%s2071_s1 + $0x98] sm:$0xff] (!%p142_p10)  ;;  %v200_v10 = vld [vmem:[%s2071_s1 + $0x10] sm:$0xff] (!%p142_p10)  ;;  %v218_v12 = vld [vmem:[%s2071_s1 + $0xa0] sm:$0xff] (!%p142_p10)  ;;  %s2017_s28 = scalar_lea.hbm (!%p142_p10), %s2072_s2, %s993_s24  ;;  %s1323_s3 = smov (!%p142_p10), [#allocation2]  }
  0x11   : > { %1060 = vmatprep.subr.msk.bf16.mxu0 (!%p142_p10), %vm1408_vm1, %v1058_v3  ;;  %1106 = vmatprep.subr.msk.bf16.mxu1 (!%p142_p10), %vm1408_vm1, %v1058_v3  ;;  %v1064_v9 = vpack.c.bf16 (!%p142_p10), %v217_v8, %v216_v6  ;;  %v201_v11 = vld [vmem:[%s2071_s1 + $0x18] sm:$0xff] (!%p142_p10)  ;;  %v219_v13 = vld [vmem:[%s2071_s1 + $0xa8] sm:$0xff] (!%p142_p10)  ;;  %v202_v18 = vld [vmem:[%s2071_s1 + $0x20] sm:$0xff] (!%p142_p10)  ;;  %s1247_s4 = sshll.u32 (!%p142_p10), %s1323_s3, 4  ;;  %s1248_s4 = int_to_ptr.vmem [resolvable:$false] %s1247_s4 }
  0x12   : > { %1063 = vmatpush3.bf16.xpose.msk.msra.mxu0 (!%p142_p10), %vm1408_vm1, %v1061_v7  ;;  %1114 = vmatpush3.bf16.xpose.msk.msra.mxu1 (!%p142_p10), %vm1408_vm1, %v1061_v7  ;;  %v1067_v14 = vpack.c.bf16 (!%p142_p10), %v201_v11, %v200_v10  ;;  %v1070_v15 = vpack.c.bf16 (!%p142_p10), %v219_v13, %v218_v12  ;;  %v203_v19 = vld [vmem:[%s2071_s1 + $0x28] sm:$0xff] (!%p142_p10)  ;;  %v220_v20 = vld [vmem:[%s2071_s1 + $0xb0] sm:$0xff] (!%p142_p10)  ;;  %v221_v21 = vld [vmem:[%s2071_s1 + $0xb8] sm:$0xff] (!%p142_p10)  ;;  %s1249_s5 = scalar_lea.vmem (!%p142_p10), %s1248_s4, 8192 }
  0x13   : > { %1066 = vmatprep.subr.msk.bf16.mxu0 (!%p142_p10), %vm1408_vm1, %v1064_v9  ;;  %1107 = vmatprep.subr.msk.bf16.mxu1 (!%p142_p10), %vm1408_vm1, %v1064_v9  ;;  %v1073_v22 = vpack.c.bf16 (!%p142_p10), %v203_v19, %v202_v18  ;;  %v1076_v23 = vpack.c.bf16 (!%p142_p10), %v221_v21, %v220_v20  ;;  %v204_v24 = vld [vmem:[%s2071_s1 + $0x30] sm:$0xff] (!%p142_p10)  ;;  %v205_v25 = vld [vmem:[%s2071_s1 + $0x38] sm:$0xff] (!%p142_p10)  ;;  %v222_v26 = vld [vmem:[%s2071_s1 + $0xc0] sm:$0xff] (!%p142_p10) }
  0x14   : > { %v223_v27 = vld [vmem:[%s2071_s1 + $0xc8] sm:$0xff] (!%p142_p10)  ;;  %v1079_v28 = vpack.c.bf16 (!%p142_p10), %v205_v25, %v204_v24  ;;  %v206_v30 = vld [vmem:[%s2071_s1 + $0x40] sm:$0xff] (!%p142_p10)  ;;  %v224_v32 = vld [vmem:[%s2071_s1 + $0xd0] sm:$0xff] (!%p142_p10) }
  0x15   : > { %v1082_v29 = vpack.c.bf16 (!%p142_p10), %v223_v27, %v222_v26  ;;  %v207_v31 = vld [vmem:[%s2071_s1 + $0x48] sm:$0xff] (!%p142_p10)  ;;  %v225_v33 = vld [vmem:[%s2071_s1 + $0xd8] sm:$0xff] (!%p142_p10)  ;;  %v208_v36 = vld [vmem:[%s2071_s1 + $0x50] sm:$0xff] (!%p142_p10) }
  0x16   : > { %s2085_s29 = smov (!%p169_p11, %s936_s29), 31  ;;  %v1085_v34 = vpack.c.bf16 %v207_v31, %v206_v30  ;;  %v1088_v35 = vpack.c.bf16 %v225_v33, %v224_v32  ;;  %v209_v37 = vld [vmem:[%s2071_s1 + $0x58] sm:$0xff]  ;;  %v226_v38 = vld [vmem:[%s2071_s1 + $0xe0] sm:$0xff]  ;;  %v227_v39 = vld [vmem:[%s2071_s1 + $0xe8] sm:$0xff] }
  0x17   : > { %s937_s20 = sshll.u32 %s2085_s29, 3  ;;  %v1091_v40 = vpack.c.bf16 %v209_v37, %v208_v36  ;;  %v1094_v41 = vpack.c.bf16 %v227_v39, %v226_v38  ;;  %v210_v42 = vld [vmem:[%s2071_s1 + $0x60] sm:$0xff]  ;;  %v211_v43 = vld [vmem:[%s2071_s1 + $0x68] sm:$0xff]  ;;  %v228_v44 = vld [vmem:[%s2071_s1 + $0xf0] sm:$0xff] }
  0x18   : > { %s1448_s30 = scalar_lea.vmem %s2070_s0, %s937_s20  ;;  %v229_v45 = vld [vmem:[%s2071_s1 + $0xf8] sm:$0xff]  ;;  %v1097_v46 = vpack.c.bf16 %v211_v43, %v210_v42  ;;  %v212_v48 = vld [vmem:[%s2071_s1 + $0x70] sm:$0xff] }
  0x19   : > { %v1451_v16 = vld [vmem:[%s1448_s30] sm:$0xff]  ;;  %v1100_v47 = vpack.c.bf16 %v229_v45, %v228_v44  ;;  %v213_v49 = vld [vmem:[%s2071_s1 + $0x78] sm:$0xff]  ;;  %v183_v51 = vld [vmem:[%s1448_s30 + $0x8] sm:$0xff] }
  0x1a   : > { %v1454_v17 = vld [vmem:[%s1448_s30 + $0x40] sm:$0xff]  ;;  %1069 = vmatpush3.bf16.xpose.msk.msra.mxu0 %vm1408_vm1, %v1067_v14  ;;  %1115 = vmatpush3.bf16.xpose.msk.msra.mxu1 %vm1408_vm1, %v1067_v14  ;;  %v1103_v50 = vpack.c.bf16 %v213_v49, %v212_v48  ;;  %v191_v52 = vld [vmem:[%s1448_s30 + $0x48] sm:$0xff]  ;;  %v184_v53 = vld [vmem:[%s1448_s30 + $0x10] sm:$0xff] }
  0x1b   : > { %1072 = vmatprep.subr.msk.bf16.mxu0 %vm1408_vm1, %v1070_v15  ;;  %1108 = vmatprep.subr.msk.bf16.mxu1 %vm1408_vm1, %v1070_v15  ;;  %v192_v54 = vld [vmem:[%s1448_s30 + $0x50] sm:$0xff]  ;;  %v185_v55 = vld [vmem:[%s1448_s30 + $0x18] sm:$0xff]  ;;  %v186_v57 = vld [vmem:[%s1448_s30 + $0x20] sm:$0xff] }
  0x1c   : > { %1026 = vmatprep.mubr.msk.f32.mxu0 %vm230_vm0, %v1451_v16  ;;  %1042 = vmatprep.mubr.msk.f32.mxu1 %vm230_vm0, %v1454_v17  ;;  %v193_v56 = vld [vmem:[%s1448_s30 + $0x58] sm:$0xff]  ;;  %v194_v58 = vld [vmem:[%s1448_s30 + $0x60] sm:$0xff]  ;;  %v187_v59 = vld [vmem:[%s1448_s30 + $0x28] sm:$0xff] }
  0x1d   : > { %v195_v60 = vld [vmem:[%s1448_s30 + $0x68] sm:$0xff]  ;;  %v188_v61 = vld [vmem:[%s1448_s30 + $0x30] sm:$0xff]  ;;  %v189_v63 = vld [vmem:[%s1448_s30 + $0x38] sm:$0xff] }
  0x1e   : > { %v196_v62 = vld [vmem:[%s1448_s30 + $0x70] sm:$0xff]  ;;  %v197_v0 = vld [vmem:[%s1448_s30 + $0x78] sm:$0xff]  ;;  %s165_s30 = sand.u32 1, %s1305_s10  }
  0x1f   : > { %s1656_s20 = sshll.u32 %s165_s30, 8  ;;  %s2024_s12 = scalar_lea.sflag [#allocation3], %s165_s30 }
  0x20   : > { %s1702_s23 = scalar_lea.vmem [#allocation2], %s1656_s20 }
  0x21   : > { %s841_s25 = sshll.u32 %s1702_s23, 4  ;;  %s2019_s25 = int_to_ptr.vmem [resolvable:$true] %s841_s25 }
  0x22   : > { %1075 = vmatpush3.bf16.xpose.msk.msra.mxu0 %vm1408_vm1, %v1073_v22  ;;  %1116 = vmatpush3.bf16.xpose.msk.msra.mxu1 %vm1408_vm1, %v1073_v22  ;;  %s1243_s29 = scalar_lea.vmem %s2019_s25, 4096  ;;  %p1250_p1 = scmp.lt.s32.totalorder %s2019_s25, %s1248_s4 }
  0x23   : > { %1078 = vmatprep.subr.msk.bf16.mxu0 %vm1408_vm1, %v1076_v23  ;;  %1109 = vmatprep.subr.msk.bf16.mxu1 %vm1408_vm1, %v1076_v23  ;;  %p1244_p12 = scmp.ne.s32.totalorder %s2019_s25, %s1243_s29  ;;  %p1251_p2 = scmp.lt.s32.totalorder %s1249_s5, %s1243_s29 }
  0x25   : > { %p1245_p13 = pnand %p1244_p12, %p1381_p4  ;;  %p1252_p3 = por %p1251_p2, %p1250_p1 }
  0x27   : > { %p1246_p0 = pneg %p1245_p13 }
  0x29   : > { %p1253_p5 = pnand %p1252_p3, %p1246_p0 }
  0x2a   : > { %1081 = vmatpush3.bf16.xpose.msk.msra.mxu0 %vm1408_vm1, %v1079_v28  ;;  %1117 = vmatpush3.bf16.xpose.msk.msra.mxu1 %vm1408_vm1, %v1079_v28 }
  0x2b   : > { %1084 = vmatprep.subr.msk.bf16.mxu0 %vm1408_vm1, %v1082_v29  ;;  %1110 = vmatprep.subr.msk.bf16.mxu1 %vm1408_vm1, %v1082_v29 }
  0x32   : > { %1087 = vmatpush3.bf16.xpose.msk.msra.mxu0 %vm1408_vm1, %v1085_v34  ;;  %1118 = vmatpush3.bf16.xpose.msk.msra.mxu1 %vm1408_vm1, %v1085_v34 }
  0x33   : > { %1090 = vmatprep.subr.msk.bf16.mxu0 %vm1408_vm1, %v1088_v35  ;;  %1111 = vmatprep.subr.msk.bf16.mxu1 %vm1408_vm1, %v1088_v35 }
  0x3a   : > { %1093 = vmatpush3.bf16.xpose.msk.msra.mxu0 %vm1408_vm1, %v1091_v40  ;;  %1119 = vmatpush3.bf16.xpose.msk.msra.mxu1 %vm1408_vm1, %v1091_v40 }
  0x3b   : > { %1096 = vmatprep.subr.msk.bf16.mxu0 %vm1408_vm1, %v1094_v41  ;;  %1112 = vmatprep.subr.msk.bf16.mxu1 %vm1408_vm1, %v1094_v41 }
  0x42   : > { %1099 = vmatpush3.bf16.xpose.msk.msra.mxu0 %vm1408_vm1, %v1097_v46  ;;  %1120 = vmatpush3.bf16.xpose.msk.msra.mxu1 %vm1408_vm1, %v1097_v46 }
  0x43   : > { %1102 = vmatprep.subr.msk.bf16.mxu0 %vm1408_vm1, %v1100_v47  ;;  %1113 = vmatprep.subr.msk.bf16.mxu1 %vm1408_vm1, %v1100_v47 }
  0x4a   : > { %1105 = vmatpush3.bf16.xpose.msk.msra.mxu0 %vm1408_vm1, %v1103_v50  ;;  %1121 = vmatpush3.bf16.xpose.msk.msra.mxu1 %vm1408_vm1, %v1103_v50 }
  0x51   : > { %1027 = vmatmul.mubr.msk.f32.vlgmr.msra.gmra.mrb[0].mxu0 %vm230_vm0, %v1451_v16  ;;  %1043 = vmatmul.mubr.msk.f32.vlgmr.msra.gmra.mrb[0].mxu1 %vm230_vm0, %v1454_v17 }
  0x52   : > { %1028 = vmatprep.mubr.msk.f32.mxu0 %vm230_vm0, %v183_v51  ;;  %1044 = vmatprep.mubr.msk.f32.mxu1 %vm230_vm0, %v191_v52 }
  0x55   : > { %1029 = vmatmul.mubr.msk.f32.gmra.mrb[2].mxu0 %vm230_vm0, %v183_v51  ;;  %1045 = vmatmul.mubr.msk.f32.gmra.mrb[2].mxu1 %vm230_vm0, %v191_v52 }
  0x56   : > { %1030 = vmatprep.mubr.msk.f32.mxu0 %vm230_vm0, %v184_v53  ;;  %1046 = vmatprep.mubr.msk.f32.mxu1 %vm230_vm0, %v192_v54 }
  0x59   : > { %1031 = vmatmul.mubr.msk.f32.gmra.mrb[4].mxu0 %vm230_vm0, %v184_v53  ;;  %1047 = vmatmul.mubr.msk.f32.gmra.mrb[4].mxu1 %vm230_vm0, %v192_v54 }
  0x5a   : > { %1032 = vmatprep.mubr.msk.f32.mxu0 %vm230_vm0, %v185_v55  ;;  %1048 = vmatprep.mubr.msk.f32.mxu1 %vm230_vm0, %v193_v56 }
  0x5d   : > { %1033 = vmatmul.mubr.msk.f32.gmra.mrb[6].mxu0 %vm230_vm0, %v185_v55  ;;  %1049 = vmatmul.mubr.msk.f32.gmra.mrb[6].mxu1 %vm230_vm0, %v193_v56 }
  0x5e   : > { %1034 = vmatprep.mubr.msk.f32.mxu0 %vm230_vm0, %v186_v57  ;;  %1050 = vmatprep.mubr.msk.f32.mxu1 %vm230_vm0, %v194_v58 }
  0x61   : > { %1035 = vmatmul.mubr.msk.f32.gmra.mrb[8].mxu0 %vm230_vm0, %v186_v57  ;;  %1051 = vmatmul.mubr.msk.f32.gmra.mrb[8].mxu1 %vm230_vm0, %v194_v58 }
  0x62   : > { %1036 = vmatprep.mubr.msk.f32.mxu0 %vm230_vm0, %v187_v59  ;;  %1052 = vmatprep.mubr.msk.f32.mxu1 %vm230_vm0, %v195_v60 }
  0x65   : > { %1037 = vmatmul.mubr.msk.f32.gmra.mrb[10].mxu0 %vm230_vm0, %v187_v59  ;;  %1053 = vmatmul.mubr.msk.f32.gmra.mrb[10].mxu1 %vm230_vm0, %v195_v60 }
  0x66   : > { %1038 = vmatprep.mubr.msk.f32.mxu0 %vm230_vm0, %v188_v61  ;;  %1054 = vmatprep.mubr.msk.f32.mxu1 %vm230_vm0, %v196_v62 }
  0x69   : > { %1039 = vmatmul.mubr.msk.f32.gmra.mrb[12].mxu0 %vm230_vm0, %v188_v61  ;;  %1055 = vmatmul.mubr.msk.f32.gmra.mrb[12].mxu1 %vm230_vm0, %v196_v62 }
  0x6a   : > { %1040 = vmatprep.mubr.msk.f32.mxu0 %vm230_vm0, %v189_v63  ;;  %1056 = vmatprep.mubr.msk.f32.mxu1 %vm230_vm0, %v197_v0 }
  0x6d   : > { %1041 = vmatmul.mubr.msk.f32.gmra.mrb[14].mxu0 %vm230_vm0, %v189_v63  ;;  %1057 = vmatmul.mubr.msk.f32.gmra.mrb[14].mxu1 %vm230_vm0, %v197_v0 }
 0x124   : > { %v441_v1 = vpop.f32.mrb[0].mxu0  ;;  %v489_v2 = vpop.f32.mrb[0].mxu1 }
 0x125   : > { %v1624_v3 = vmax.f32 %v441_v1, 0.0  ;;  %v1626_v4 = vmax.f32 %v489_v2, 0.0  ;;  %v443_v5 = vpop.f32.mrb[1].mxu0  ;;  %v491_v6 = vpop.f32.mrb[1].mxu1 }
 0x126   : > { %v1628_v7 = vmax.f32 %v443_v5, 0.0  ;;  %v1630_v8 = vmax.f32 %v491_v6, 0.0 }
 0x127   : > { %1179 = vrsqrt.f32 %v1624_v3  ;;  %vm570_vm2 = vcmp.eq.f32.partialorder %v1624_v3, inf  ;;  %vm572_vm3 = vcmp.eq.f32.partialorder %v1624_v3, 0.0  ;;  %v573_v21 = vand.u32 2147483648, %v1624_v3 }
 0x128   : > { %1181 = vrsqrt.f32 %v1626_v4  ;;  %v447_v9 = vpop.f32.mrb[2].mxu0  ;;  %v495_v10 = vpop.f32.mrb[2].mxu1  ;;  %vm682_vm4 = vcmp.eq.f32.partialorder %v1626_v4, inf  ;;  %vm684_vm5 = vcmp.eq.f32.partialorder %v1626_v4, 0.0  ;;  %v685_v22 = vand.u32 2147483648, %v1626_v4 }
 0x129   : > { %1183 = vrsqrt.f32 %v1628_v7  ;;  %v449_v11 = vpop.f32.mrb[3].mxu0  ;;  %v497_v12 = vpop.f32.mrb[3].mxu1  ;;  %v1636_v13 = vmax.f32 %v447_v9, 0.0  ;;  %v1638_v14 = vmax.f32 %v495_v10, 0.0  ;;  %vm577_vm6 = vcmp.eq.f32.partialorder %v1628_v7, inf }
 0x12a   : > { %1185 = vrsqrt.f32 %v1630_v8  ;;  %v1640_v15 = vmax.f32 %v449_v11, 0.0  ;;  %v1642_v16 = vmax.f32 %v497_v12, 0.0  ;;  %vm579_vm7 = vcmp.eq.f32.partialorder %v1628_v7, 0.0 }
 0x12b   : > { %1187 = vrsqrt.f32 %v1636_v13  ;;  %v580_v23 = vand.u32 2147483648, %v1628_v7  ;;  %vm689_vm8 = vcmp.eq.f32.partialorder %v1630_v8, inf  ;;  %vm691_vm9 = vcmp.eq.f32.partialorder %v1630_v8, 0.0 }
 0x12c   : > { %v453_v17 = vpop.f32.mrb[4].mxu0  ;;  %v501_v18 = vpop.f32.mrb[4].mxu1  ;;  %1189 = vrsqrt.f32 %v1638_v14  ;;  %v692_v33 = vand.u32 2147483648, %v1630_v8  ;;  %vm584_vm10 = vcmp.eq.f32.partialorder %v1636_v13, inf  ;;  %vm586_vm11 = vcmp.eq.f32.partialorder %v1636_v13, 0.0 }
 0x12d   : > { %v455_v19 = vpop.f32.mrb[5].mxu0  ;;  %v503_v20 = vpop.f32.mrb[5].mxu1  ;;  %1191 = vrsqrt.f32 %v1640_v15  ;;  %v1664_v27 = vmax.f32 %v453_v17, 0.0  ;;  %v1666_v28 = vmax.f32 %v501_v18, 0.0  ;;  %v587_v36 = vand.u32 2147483648, %v1636_v13 }
 0x12e   : > { %1193 = vrsqrt.f32 %v1642_v16  ;;  %v1677_v37 = vmax.f32 %v455_v19, 0.0  ;;  %vm696_vm12 = vcmp.eq.f32.partialorder %v1638_v14, inf  ;;  %v1695_v46 = vmax.f32 %v503_v20, 0.0 }
 0x12f   : > { %1195 = vrsqrt.f32 %v1664_v27  ;;  %vm698_vm13 = vcmp.eq.f32.partialorder %v1638_v14, 0.0  ;;  %v699_v55 = vand.u32 2147483648, %v1638_v14  ;;  %vm591_vm14 = vcmp.eq.f32.partialorder %v1640_v15, inf }
 0x130   : > { %v459_v24 = vpop.f32.mrb[6].mxu0  ;;  %v507_v25 = vpop.f32.mrb[6].mxu1  ;;  %1197 = vrsqrt.f32 %v1666_v28  ;;  %vm593_vm15 = vcmp.eq.f32.partialorder %v1640_v15, 0.0  ;;  %v594_v63 = vand.u32 2147483648, %v1640_v15  ;;  %vm703_vm0 = vcmp.eq.f32.partialorder %v1642_v16, inf }
 0x131   : > { %v1180_v26 = vpop.eup %1179  ;;  %v461_v29 = vpop.f32.mrb[7].mxu0  ;;  %v1711_v51 = vmax.f32 %v459_v24, 0.0  ;;  %1199 = vrsqrt.f32 %v1677_v37  ;;  %v1735_v0 = vmax.f32 %v507_v25, 0.0  ;;  %vm705_vm1 = vcmp.eq.f32.partialorder %v1642_v16, 0.0 }
 0x132   : > { %v1668_v30 = vpop.f32.mrb[7].mxu1  ;;  %v1182_v31 = vpop.eup %1181  ;;  %v569_v32 = vmul.f32 %v1180_v26, %v1624_v3  ;;  %1201 = vrsqrt.f32 %v1695_v46  ;;  %v1753_v9 = vmax.f32 %v461_v29, 0.0  ;;  %v706_v12 = vand.u32 2147483648, %v1642_v16 }
 0x133   : > { %v1184_v34 = vpop.eup %1183  ;;  %v681_v35 = vmul.f32 %v1182_v31, %v1626_v4  ;;  %1203 = vrsqrt.f32 %v1711_v51  ;;  %v713_v26 = vand.u32 2147483648, %v1666_v28  ;;  %v1791_v29 = vmax.f32 %v1668_v30, 0.0 }
 0x134   : > { %v1186_v38 = vpop.eup %1185  ;;  %v571_v39 = vsel %vm570_vm2, %v1624_v3, %v569_v32  ;;  %v576_v40 = vmul.f32 %v1184_v34, %v1628_v7  ;;  %v1685_v41 = vpop.f32.mrb[8].mxu0  ;;  %vm598_vm2 = vcmp.eq.f32.partialorder %v1664_v27, inf  ;;  %1205 = vrsqrt.f32 %v1735_v0 }
 0x135   : > { %v1687_v42 = vpop.f32.mrb[8].mxu1  ;;  %v574_v43 = vsel %vm572_vm3, %v573_v21, %v571_v39  ;;  %v683_v44 = vsel %vm682_vm4, %v1626_v4, %v681_v35  ;;  %v688_v45 = vmul.f32 %v1186_v38, %v1630_v8  ;;  %v1697_v47 = vpop.f32.mrb[9].mxu0  ;;  %vm600_vm3 = vcmp.eq.f32.partialorder %v1664_v27, 0.0 }
 0x136   : > { %v1699_v48 = vpop.f32.mrb[9].mxu1  ;;  %792 = vst [vmem:[%s1702_s23] sm:$0xff] %v574_v43  ;;  %v686_v49 = vsel %vm684_vm5, %v685_v22, %v683_v44  ;;  %v578_v50 = vsel %vm577_vm6, %v1628_v7, %v576_v40  ;;  %v1188_v52 = vpop.eup %1187  ;;  %vm710_vm4 = vcmp.eq.f32.partialorder %v1666_v28, inf  ;;  %vm712_vm5 = vcmp.eq.f32.partialorder %v1666_v28, 0.0 }
 0x137   : > { %808 = vst [vmem:[%s1702_s23 + $0x80] sm:$0xff] %v686_v49  ;;  %v581_v53 = vsel %vm579_vm7, %v580_v23, %v578_v50  ;;  %v690_v54 = vsel %vm689_vm8, %v1630_v8, %v688_v45  ;;  %v1190_v56 = vpop.eup %1189  ;;  %v583_v58 = vmul.f32 %v1188_v52, %v1636_v13  ;;  %1207 = vrsqrt.f32 %v1753_v9 }
 0x138   : > { %793 = vst [vmem:[%s1702_s23 + $0x8] sm:$0xff] %v581_v53  ;;  %v693_v57 = vsel %vm691_vm9, %v692_v33, %v690_v54  ;;  %v1727_v59 = vpop.f32.mrb[10].mxu0  ;;  %v1729_v60 = vpop.f32.mrb[10].mxu1  ;;  %v695_v62 = vmul.f32 %v1190_v56, %v1638_v14  ;;  %v1794_v31 = vmax.f32 %v1685_v41, 0.0  ;;  %vm605_vm6 = vcmp.eq.f32.partialorder %v1677_v37, inf }
 0x139   : > { %v1192_v61 = vpop.eup %1191  ;;  %809 = vst [vmem:[%s1702_s23 + $0x88] sm:$0xff] %v693_v57  ;;  %v1737_v1 = vpop.f32.mrb[11].mxu0  ;;  %v585_v4 = vsel %vm584_vm10, %v1636_v13, %v583_v58  ;;  %1209 = vrsqrt.f32 %v1791_v29  ;;  %v1815_v41 = vmax.f32 %v1697_v47, 0.0  ;;  %vm607_vm7 = vcmp.eq.f32.partialorder %v1677_v37, 0.0 }
 0x13a   : > { %v1739_v2 = vpop.f32.mrb[11].mxu1  ;;  %v1194_v3 = vpop.eup %1193  ;;  %v590_v5 = vmul.f32 %v1192_v61, %v1640_v15  ;;  %v588_v6 = vsel %vm586_vm11, %v587_v36, %v585_v4  ;;  %v697_v7 = vsel %vm696_vm12, %v1638_v14, %v695_v62  ;;  %vm717_vm8 = vcmp.eq.f32.partialorder %v1695_v46, inf }
 0x13b   : > { %v702_v8 = vmul.f32 %v1194_v3, %v1642_v16  ;;  %794 = vst [vmem:[%s1702_s23 + $0x10] sm:$0xff] %v588_v6  ;;  %v700_v10 = vsel %vm698_vm13, %v699_v55, %v697_v7  ;;  %v1196_v18 = vpop.eup %1195  ;;  %1211 = vrsqrt.f32 %v1794_v31  ;;  %vm719_vm9 = vcmp.eq.f32.partialorder %v1695_v46, 0.0 }
 0x13c   : > { %v592_v11 = vsel %vm591_vm14, %v1640_v15, %v590_v5  ;;  %v1763_v13 = vpop.f32.mrb[12].mxu0  ;;  %v1765_v17 = vpop.f32.mrb[12].mxu1  ;;  %810 = vst [vmem:[%s1702_s23 + $0x90] sm:$0xff] %v700_v10  ;;  %v597_v24 = vmul.f32 %v1196_v18, %v1664_v27  ;;  %v601_v15 = vand.u32 2147483648, %v1664_v27  ;;  %v720_v47 = vand.u32 2147483648, %v1695_v46 }
 0x13d   : > { %v595_v14 = vsel %vm593_vm15, %v594_v63, %v592_v11  ;;  %v704_v19 = vsel %vm703_vm0, %v1642_v16, %v702_v8  ;;  %v1775_v20 = vpop.f32.mrb[13].mxu0  ;;  %v1777_v21 = vpop.f32.mrb[13].mxu1  ;;  %vm612_vm10 = vcmp.eq.f32.partialorder %v1711_v51, inf  ;;  %vm614_vm11 = vcmp.eq.f32.partialorder %v1711_v51, 0.0 }
 0x13e   : > { %v1198_v22 = vpop.eup %1197  ;;  %795 = vst [vmem:[%s1702_s23 + $0x18] sm:$0xff] %v595_v14  ;;  %v707_v23 = vsel %vm705_vm1, %v706_v12, %v704_v19  ;;  %v599_v25 = vsel %vm598_vm2, %v1664_v27, %v597_v24  ;;  %v1803_v27 = vmax.f32 %v1687_v42, 0.0  ;;  %v608_v42 = vand.u32 2147483648, %v1677_v37 }
 0x13f   : > { %811 = vst [vmem:[%s1702_s23 + $0x98] sm:$0xff] %v707_v23  ;;  %v709_v16 = vmul.f32 %v1198_v22, %v1666_v28  ;;  %v1200_v34 = vpop.eup %1199  ;;  %v602_v35 = vsel %vm600_vm3, %v601_v15, %v599_v25  ;;  %vm724_vm12 = vcmp.eq.f32.partialorder %v1735_v0, inf  ;;  %vm726_vm13 = vcmp.eq.f32.partialorder %v1735_v0, 0.0 }
 0x140   : > { %v1796_v32 = vpop.f32.mrb[14].mxu0  ;;  %v1798_v33 = vpop.f32.mrb[14].mxu1  ;;  %796 = vst [vmem:[%s1702_s23 + $0x20] sm:$0xff] %v602_v35  ;;  %v604_v40 = vmul.f32 %v1200_v34, %v1677_v37  ;;  %1213 = vrsqrt.f32 %v1803_v27  ;;  %v1843_v58 = vmax.f32 %v1699_v48, 0.0  ;;  %vm619_vm14 = vcmp.eq.f32.partialorder %v1753_v9, inf }
 0x141   : > { %v711_v36 = vsel %vm710_vm4, %v1666_v28, %v709_v16  ;;  %v1805_v38 = vpop.f32.mrb[15].mxu0  ;;  %v1807_v30 = vpop.f32.mrb[15].mxu1  ;;  %1215 = vrsqrt.f32 %v1815_v41  ;;  %vm621_vm15 = vcmp.eq.f32.partialorder %v1753_v9, 0.0  ;;  %v1852_v62 = vmax.f32 %v1729_v60, 0.0 }
 0x142   : > { %v714_v39 = vsel %vm712_vm5, %v713_v26, %v711_v36  ;;  %v1202_v43 = vpop.eup %1201  ;;  %v606_v44 = vsel %vm605_vm6, %v1677_v37, %v604_v40  ;;  %v615_v37 = vand.u32 2147483648, %v1711_v51  ;;  %1217 = vrsqrt.f32 %v1843_v58 }
 0x143   : > { %812 = vst [vmem:[%s1702_s23 + $0xa0] sm:$0xff] %v714_v39  ;;  %v1204_v28 = vpop.eup %1203  ;;  %v716_v45 = vmul.f32 %v1202_v43, %v1695_v46  ;;  %v609_v49 = vsel %vm607_vm7, %v608_v42, %v606_v44  ;;  %v1858_v48 = vmax.f32 %v1737_v1, 0.0  ;;  %v622_v5 = vand.u32 2147483648, %v1753_v9 }
 0x144   : > { %v611_v50 = vmul.f32 %v1204_v28, %v1711_v51  ;;  %797 = vst [vmem:[%s1702_s23 + $0x28] sm:$0xff] %v609_v49  ;;  %v1206_v53 = vpop.eup %1205  ;;  %vm731_vm0 = vcmp.eq.f32.partialorder %v1791_v29, inf  ;;  %vm733_vm1 = vcmp.eq.f32.partialorder %v1791_v29, 0.0  ;;  %v734_v6 = vand.u32 2147483648, %v1791_v29 }
 0x145   : > { %v718_v52 = vsel %vm717_vm8, %v1695_v46, %v716_v45  ;;  %v723_v57 = vmul.f32 %v1206_v53, %v1735_v0  ;;  %v727_v46 = vand.u32 2147483648, %v1735_v0  ;;  %v1208_v61 = vpop.eup %1207  ;;  %v1870_v1 = vmax.f32 %v1739_v2, 0.0 }
 0x146   : > { %v721_v54 = vsel %vm719_vm9, %v720_v47, %v718_v52  ;;  %v613_v55 = vsel %vm612_vm10, %v1711_v51, %v611_v50  ;;  %v1849_v51 = vmax.f32 %v1727_v59, 0.0  ;;  %v618_v3 = vmul.f32 %v1208_v61, %v1753_v9  ;;  %v1210_v59 = vpop.eup %1209 }
 0x147   : > { %813 = vst [vmem:[%s1702_s23 + $0xa8] sm:$0xff] %v721_v54  ;;  %v616_v56 = vsel %vm614_vm11, %v615_v37, %v613_v55  ;;  %v725_v63 = vsel %vm724_vm12, %v1735_v0, %v723_v57  ;;  %v1212_v0 = vpop.eup %1211  ;;  %v730_v8 = vmul.f32 %v1210_v59, %v1791_v29  ;;  %vm626_vm2 = vcmp.eq.f32.partialorder %v1794_v31, inf }
 0x148   : > { %798 = vst [vmem:[%s1702_s23 + $0x30] sm:$0xff] %v616_v56  ;;  %v728_v4 = vsel %vm726_vm13, %v727_v46, %v725_v63  ;;  %1219 = vrsqrt.f32 %v1849_v51  ;;  %v620_v60 = vsel %vm619_vm14, %v1753_v9, %v618_v3  ;;  %v625_v10 = vmul.f32 %v1212_v0, %v1794_v31 }
 0x149   : > { %814 = vst [vmem:[%s1702_s23 + $0xb0] sm:$0xff] %v728_v4  ;;  %v623_v7 = vsel %vm621_vm15, %v622_v5, %v620_v60  ;;  %1221 = vrsqrt.f32 %v1852_v62  ;;  %vm628_vm3 = vcmp.eq.f32.partialorder %v1794_v31, 0.0  ;;  %v629_v11 = vand.u32 2147483648, %v1794_v31 }
 0x14a   : > { %799 = vst [vmem:[%s1702_s23 + $0x38] sm:$0xff] %v623_v7  ;;  %1223 = vrsqrt.f32 %v1858_v48  ;;  %v1214_v2 = vpop.eup %1213  ;;  %v732_v9 = vsel %vm731_vm0, %v1791_v29, %v730_v8  ;;  %vm738_vm4 = vcmp.eq.f32.partialorder %v1803_v27, inf  ;;  %vm740_vm5 = vcmp.eq.f32.partialorder %v1803_v27, 0.0 }
 0x14b   : > { %v741_v12 = vand.u32 2147483648, %v1803_v27  ;;  %v1216_v18 = vpop.eup %1215  ;;  %v735_v14 = vsel %vm733_vm1, %v734_v6, %v732_v9  ;;  %v627_v19 = vsel %vm626_vm2, %v1794_v31, %v625_v10  ;;  %v737_v22 = vmul.f32 %v1214_v2, %v1803_v27 }
 0x14c   : > { %1225 = vrsqrt.f32 %v1870_v1  ;;  %815 = vst [vmem:[%s1702_s23 + $0xb8] sm:$0xff] %v735_v14  ;;  %v630_v23 = vsel %vm628_vm3, %v629_v11, %v627_v19  ;;  %v632_v24 = vmul.f32 %v1216_v18, %v1815_v41  ;;  %vm633_vm6 = vcmp.eq.f32.partialorder %v1815_v41, inf  ;;  %v1218_v35 = vpop.eup %1217 }
 0x14d   : > { %vm635_vm7 = vcmp.eq.f32.partialorder %v1815_v41, 0.0  ;;  %800 = vst [vmem:[%s1702_s23 + $0x40] sm:$0xff] %v630_v23  ;;  %v739_v15 = vsel %vm738_vm4, %v1803_v27, %v737_v22  ;;  %v636_v16 = vand.u32 2147483648, %v1815_v41  ;;  %v1901_v25 = vmax.f32 %v1763_v13, 0.0 }
 0x14e   : > { %v1904_v26 = vmax.f32 %v1765_v17, 0.0  ;;  %v742_v29 = vsel %vm740_vm5, %v741_v12, %v739_v15  ;;  %v634_v31 = vsel %vm633_vm6, %v1815_v41, %v632_v24  ;;  %vm745_vm8 = vcmp.eq.f32.partialorder %v1843_v58, inf }
 0x14f   : > { %v1911_v34 = vmax.f32 %v1775_v20, 0.0  ;;  %816 = vst [vmem:[%s1702_s23 + $0xc0] sm:$0xff] %v742_v29  ;;  %v637_v36 = vsel %vm635_vm7, %v636_v16, %v634_v31  ;;  %vm747_vm9 = vcmp.eq.f32.partialorder %v1843_v58, 0.0  ;;  %1227 = vrsqrt.f32 %v1901_v25 }
 0x150   : > { %v1917_v13 = vmax.f32 %v1777_v21, 0.0  ;;  %801 = vst [vmem:[%s1702_s23 + $0x48] sm:$0xff] %v637_v36  ;;  %v744_v27 = vmul.f32 %v1218_v35, %v1843_v58  ;;  %v748_v39 = vand.u32 2147483648, %v1843_v58  ;;  %vm640_vm10 = vcmp.eq.f32.partialorder %v1849_v51, inf }
 0x151   : > { %1229 = vrsqrt.f32 %v1904_v26  ;;  %vm642_vm11 = vcmp.eq.f32.partialorder %v1849_v51, 0.0  ;;  %v643_v40 = vand.u32 2147483648, %v1849_v51  ;;  %vm752_vm12 = vcmp.eq.f32.partialorder %v1852_v62, inf }
 0x152   : > { %v1220_v17 = vpop.eup %1219  ;;  %1231 = vrsqrt.f32 %v1911_v34  ;;  %v746_v41 = vsel %vm745_vm8, %v1843_v58, %v744_v27  ;;  %vm754_vm13 = vcmp.eq.f32.partialorder %v1852_v62, 0.0  ;;  %v755_v43 = vand.u32 2147483648, %v1852_v62 }
 0x153   : > { %v639_v20 = vmul.f32 %v1220_v17, %v1849_v51  ;;  %v1222_v21 = vpop.eup %1221  ;;  %v749_v28 = vsel %vm747_vm9, %v748_v39, %v746_v41  ;;  %1233 = vrsqrt.f32 %v1917_v13  ;;  %vm647_vm14 = vcmp.eq.f32.partialorder %v1858_v48, inf }
 0x154   : > { %v1224_v42 = vpop.eup %1223  ;;  %v751_v45 = vmul.f32 %v1222_v21, %v1852_v62  ;;  %817 = vst [vmem:[%s1702_s23 + $0xc8] sm:$0xff] %v749_v28  ;;  %vm649_vm15 = vcmp.eq.f32.partialorder %v1858_v48, 0.0  ;;  %v650_v37 = vand.u32 2147483648, %v1858_v48  ;;  %v1947_v53 = vmax.f32 %v1796_v32, 0.0 }
 0x155   : > { %v641_v44 = vsel %vm640_vm10, %v1849_v51, %v639_v20  ;;  %v646_v49 = vmul.f32 %v1224_v42, %v1858_v48  ;;  %v1950_v54 = vmax.f32 %v1798_v33, 0.0  ;;  %v1957_v46 = vmax.f32 %v1805_v38, 0.0 }
 0x156   : > { %v644_v47 = vsel %vm642_vm11, %v643_v40, %v641_v44  ;;  %v1226_v50 = vpop.eup %1225  ;;  %v753_v52 = vsel %vm752_vm12, %v1852_v62, %v751_v45  ;;  %vm759_vm0 = vcmp.eq.f32.partialorder %v1870_v1, inf  ;;  %v762_v32 = vand.u32 2147483648, %v1870_v1 }
 0x157   : > { %802 = vst [vmem:[%s1702_s23 + $0x50] sm:$0xff] %v644_v47  ;;  %v756_v55 = vsel %vm754_vm13, %v755_v43, %v753_v52  ;;  %v648_v56 = vsel %vm647_vm14, %v1858_v48, %v646_v49  ;;  %v758_v57 = vmul.f32 %v1226_v50, %v1870_v1  ;;  %1235 = vrsqrt.f32 %v1947_v53 }
 0x158   : > { %818 = vst [vmem:[%s1702_s23 + $0xd0] sm:$0xff] %v756_v55  ;;  %v651_v58 = vsel %vm649_vm15, %v650_v37, %v648_v56  ;;  %vm761_vm1 = vcmp.eq.f32.partialorder %v1870_v1, 0.0  ;;  %1237 = vrsqrt.f32 %v1950_v54  ;;  %vm654_vm2 = vcmp.eq.f32.partialorder %v1901_v25, inf }
 0x159   : > { %803 = vst [vmem:[%s1702_s23 + $0x58] sm:$0xff] %v651_v58  ;;  %v760_v33 = vsel %vm759_vm0, %v1870_v1, %v758_v57  ;;  %v1228_v61 = vpop.eup %1227  ;;  %1239 = vrsqrt.f32 %v1957_v46  ;;  %vm656_vm3 = vcmp.eq.f32.partialorder %v1901_v25, 0.0  ;;  %v657_v63 = vand.u32 2147483648, %v1901_v25 }
 0x15a   : > { %v763_v51 = vsel %vm761_vm1, %v762_v32, %v760_v33  ;;  %v653_v62 = vmul.f32 %v1228_v61, %v1901_v25  ;;  %vm766_vm4 = vcmp.eq.f32.partialorder %v1904_v26, inf  ;;  %vm768_vm5 = vcmp.eq.f32.partialorder %v1904_v26, 0.0 }
 0x15b   : > { %v1230_v38 = vpop.eup %1229  ;;  %819 = vst [vmem:[%s1702_s23 + $0xd8] sm:$0xff] %v763_v51  ;;  %v567_v4 = vmax.f32 %v1807_v30, 0.0  ;;  %v769_v59 = vand.u32 2147483648, %v1904_v26  ;;  %vm661_vm6 = vcmp.eq.f32.partialorder %v1911_v34, inf  ;;  %v664_v7 = vand.u32 2147483648, %v1911_v34 }
 0x15c   : > { %v1232_v3 = vpop.eup %1231  ;;  %v765_v48 = vmul.f32 %v1230_v38, %v1904_v26  ;;  %v655_v5 = vsel %vm654_vm2, %v1901_v25, %v653_v62  ;;  %vm663_vm7 = vcmp.eq.f32.partialorder %v1911_v34, 0.0  ;;  %vm773_vm8 = vcmp.eq.f32.partialorder %v1917_v13, inf }
 0x15d   : > { %v660_v60 = vmul.f32 %v1232_v3, %v1911_v34  ;;  %v1234_v6 = vpop.eup %1233  ;;  %v658_v1 = vsel %vm656_vm3, %v657_v63, %v655_v5  ;;  %1241 = vrsqrt.f32 %v567_v4  ;;  %v776_v2 = vand.u32 2147483648, %v1917_v13 }
 0x15e   : > { %v767_v0 = vsel %vm766_vm4, %v1904_v26, %v765_v48  ;;  %804 = vst [vmem:[%s1702_s23 + $0x60] sm:$0xff] %v658_v1  ;;  %v772_v10 = vmul.f32 %v1234_v6, %v1917_v13  ;;  %vm775_vm9 = vcmp.eq.f32.partialorder %v1917_v13, 0.0  ;;  %vm668_vm10 = vcmp.eq.f32.partialorder %v1947_v53, inf }
 0x15f   : > { %v770_v8 = vsel %vm768_vm5, %v769_v59, %v767_v0  ;;  %v662_v30 = vsel %vm661_vm6, %v1911_v34, %v660_v60  ;;  %vm670_vm11 = vcmp.eq.f32.partialorder %v1947_v53, 0.0  ;;  %v671_v23 = vand.u32 2147483648, %v1947_v53 }
 0x160   : > { %820 = vst [vmem:[%s1702_s23 + $0xe0] sm:$0xff] %v770_v8  ;;  %v665_v11 = vsel %vm663_vm7, %v664_v7, %v662_v30  ;;  %v774_v9 = vsel %vm773_vm8, %v1917_v13, %v772_v10  ;;  %vm780_vm12 = vcmp.eq.f32.partialorder %v1950_v54, inf  ;;  %vm782_vm13 = vcmp.eq.f32.partialorder %v1950_v54, 0.0 }
 0x161   : > { %805 = vst [vmem:[%s1702_s23 + $0x68] sm:$0xff] %v665_v11  ;;  %v1236_v12 = vpop.eup %1235  ;;  %v777_v18 = vsel %vm775_vm9, %v776_v2, %v774_v9  ;;  %v783_v16 = vand.u32 2147483648, %v1950_v54  ;;  %vm675_vm14 = vcmp.eq.f32.partialorder %v1957_v46, inf  ;;  %v678_v31 = vand.u32 2147483648, %v1957_v46 }
 0x162   : > { %v1238_v14 = vpop.eup %1237  ;;  %821 = vst [vmem:[%s1702_s23 + $0xe8] sm:$0xff] %v777_v18  ;;  %v667_v19 = vmul.f32 %v1236_v12, %v1947_v53  ;;  %vm677_vm15 = vcmp.eq.f32.partialorder %v1957_v46, 0.0  ;;  %vm787_vm0 = vcmp.eq.f32.partialorder %v567_v4, inf  ;;  %v790_v27 = vand.u32 2147483648, %v567_v4 }
 0x163   : > { %v1240_v22 = vpop.eup %1239  ;;  %v779_v24 = vmul.f32 %v1238_v14, %v1950_v54  ;;  %vm789_vm1 = vcmp.eq.f32.partialorder %v567_v4, 0.0 }
 0x164   : > { %v669_v15 = vsel %vm668_vm10, %v1947_v53, %v667_v19  ;;  %v674_v25 = vmul.f32 %v1240_v22, %v1957_v46 }
 0x165   : > { %v672_v26 = vsel %vm670_vm11, %v671_v23, %v669_v15  ;;  %v781_v29 = vsel %vm780_vm12, %v1950_v54, %v779_v24 }
 0x166   : > { %806 = vst [vmem:[%s1702_s23 + $0x70] sm:$0xff] %v672_v26  ;;  %v784_v34 = vsel %vm782_vm13, %v783_v16, %v781_v29  ;;  %v676_v35 = vsel %vm675_vm14, %v1957_v46, %v674_v25 }
 0x167   : > { %v1242_v36 = vpop.eup %1241  ;;  %822 = vst [vmem:[%s1702_s23 + $0xf0] sm:$0xff] %v784_v34  ;;  %v679_v13 = vsel %vm677_vm15, %v678_v31, %v676_v35 }
 0x168   : > { %807 = vst [vmem:[%s1702_s23 + $0x78] sm:$0xff] %v679_v13  ;;  %v786_v17 = vmul.f32 %v1242_v36, %v567_v4 }
 0x16a   : > { %v788_v39 = vsel %vm787_vm0, %v567_v4, %v786_v17 }
 0x16b   : > { %v791_v20 = vsel %vm789_vm1, %v790_v27, %v788_v39 }
 0x16c   : > { %823 = vst [vmem:[%s1702_s23 + $0xf8] sm:$0xff] %v791_v20 }
 0x16d   : > { %1256 = shalt.err (!%p1253_p5)
}
 0x16e   : > { %s1257_s6 = scalar_lea.hbm %s2017_s28, 4096  ;;  %s1261_s15 = scalar_lea.hbm %s2072_s2, 8192 }
 0x16f   : > { %p1258_p6 = scmp.ne.s32.totalorder %s2017_s28, %s1257_s6  ;;  %p1262_p10 = scmp.lt.u32.totalorder %s2017_s28, %s2072_s2 }
 0x170   : > { %p1263_p11 = scmp.lt.u32.totalorder %s1261_s15, %s1257_s6  ;;  %p1265_p13 = scmp.lt.u32.totalorder %s1257_s6, %s2017_s28 }
 0x171   : > { %p1259_p7 = pnand %p1258_p6, %p1381_p4 }
 0x172   : > { %p1264_p12 = por %p1263_p11, %p1262_p10 }
 0x173   : > { %p1260_p9 = pneg %p1259_p7 }
 0x174   : > { %p1266_p0 = por %p1265_p13, %p1264_p12 }
 0x176   : > { %p1267_p1 = pnand %p1266_p0, %p1260_p9 }
 0x178   : > { %1270 = shalt.err (!%p1267_p1)
}
 0x179   : > { %s1324_s30 = smov 256   ;;  %s1325_s20 = smov 16  }
 0x17a   : > { %1122 = dma.vmem_to_hbm [thread:$0]  (%p1381_p4), %s2019_s25, 4096, %s2017_s28, %s2024_s12, %s1324_s30, %s1324_s30, %s1325_s20  }
 0x17b PF: > { %p1128_p2 = scmp.ge.s32.totalorder %s1321_s14, 2  ;;  %s856_s23 = sand.u32 1, %s1301_s9  }
 0x17c   : > { %s857_s24 = scalar_lea.sflag [#allocation3], %s856_s23 }
 0x17d   : > { %p1125_p3 = pnand %p1128_p2, %p1388_p8 }
 0x17f   : > { %1296 = dma.done.wait (!%p1125_p3), %s857_s24, 4096  }
 0x180   : > { %1298 = vsyncadd (!%p1125_p3), %s857_s24, 4294963200  ;;  %s15_s14 = sadd.s32 1, %s1321_s14   ;;  %s2077_s9 = smov %s1305_s10 }
 0x181   : > { %p12_p5 = scmp.ge.s32.totalorder %s15_s14, 4   ;;  %s2078_s10 = smov %s1309_s11 }
 0x182   : > { %s2079_s11 = smov %s1394_s22  ;;  %s2080_s12 = smov %s1317_s13 }
 0x183   : > { %s2081_s13 = smov %s2083_s17  ;;  %14 = sbr.rel (!%p12_p5) target bundleno = 4 (0x4), region = 66 }
 0x18a   :  { %862 = vsyncpa [#allocation3], 1 }
 0x18b   :  { %864 = vsyncpa [#allocation3 + $0x1], 1 }

</bundles_post_ra>
